<compile_context>
chip_gen: v7x
topology: tpu7x:2x2x1
jax: 0.10.0
libtpu: 0.0.40
codegen_flags: <defaults>
</compile_context>

<pallas_src>
import functools

import jax
import jax.numpy as jnp
from jax.experimental import pallas as pl
from jax.experimental.pallas import tpu as pltpu


# ----------------------------------------------------------------------------
# helpers
# ----------------------------------------------------------------------------
def _round_up(n, m):
    return ((n + m - 1) // m) * m


def _vmem_info():
    """(physical VMEM bytes, detected?) — conservative 64 MiB if undetectable."""
    try:
        cap = int(pltpu.get_tpu_info().vmem_capacity_bytes)
        return cap, True
    except Exception:
        return 64 * 1024 * 1024, False


def _make_adj_spec(tm, tk, bufs):
    index_map = lambda i, k: (i, k)
    if bufs != 2:
        try:  # deeper pipelining for the dominant HBM stream (v7x)
            return pl.BlockSpec((tm, tk), index_map,
                                pipeline_mode=pl.Buffered(bufs))
        except Exception:
            pass  # older jax: fall back to default double buffering
    return pl.BlockSpec((tm, tk), index_map)


def _plan(n_p, c_in_max_p, c_out_max_p, out_itemsize_max):
    """Generation/budget-aware tile + residency + VMEM-limit selection."""
    cap, detected = _vmem_info()
    budget = int(min(cap * 3 // 4, 100 * 1024 * 1024))   # ~96 MiB v5e/v6e, 48 MiB v7x
    adj_bufs = 3 if (detected and cap <= 80 * 1024 * 1024) else 2

    # X is tiny next to A_hat (N x 128 bf16); keep it VMEM-resident if it fits.
    x_res_bytes = 2 * n_p * c_in_max_p * 2
    x_resident = x_res_bytes <= budget // 4

    tm_cands = [c for c in (1024, 512, 256, 128, 64) if c <= n_p and n_p % c == 0]
    tk_cands = [c for c in (2048, 1024, 512, 256, 128) if c <= n_p and n_p % c == 0]
    # >= 2 (preferably even number of) row blocks so the "parallel" axis can
    # shard across v7x's two TensorCores.
    pref = [c for c in tm_cands if (n_p // c) >= 2 and (n_p // c) % 2 == 0]
    pref = pref or [c for c in tm_cands if (n_p // c) >= 2] or tm_cands

    def needed(tm, tk):
        return (adj_bufs * tm * tk * 2                                   # A_hat tiles (bf16)
                + (x_res_bytes if x_resident else 2 * tk * c_in_max_p * 2)
                + 2 * c_in_max_p * c_out_max_p * 2                       # W (bf16)
                + 2 * c_out_max_p * 4                                    # bias (f32)
                + tm * c_out_max_p * 4                                   # f32 accumulator
                + 2 * tm * c_out_max_p * out_itemsize_max)               # output tiles

    tm, tk = pref[-1], tk_cands[-1]
    for tm_c in pref:
        hit = None
        for tk_c in tk_cands:
            if needed(tm_c, tk_c) <= budget:
                hit = tk_c
                break
        if hit is not None:
            tm, tk = tm_c, hit
            break

    vmem_limit = int(min(budget, max(2 * needed(tm, tk), 32 * 1024 * 1024)))
    return {"tm": tm, "tk": tk, "x_resident": x_resident,
            "adj_bufs": adj_bufs, "vmem_limit": vmem_limit}


# ----------------------------------------------------------------------------
# fused GCN layer kernel:  out = A_hat @ (X @ W) + b   (+ optional ReLU)
# ----------------------------------------------------------------------------
def _fused_gcn_kernel(adj_ref, x_ref, w_ref, b_ref, o_ref, acc_ref, *,
                      apply_relu, tk, x_resident):
    k = pl.program_id(1)

    @pl.when(k == 0)
    def _():
        acc_ref[...] = jnp.zeros_like(acc_ref)

    if x_resident:
        row0 = pl.multiple_of(k * tk, tk)
        x_tile = x_ref[pl.ds(row0, tk), :]          # slice of the resident X
    else:
        x_tile = x_ref[...]                         # streamed (tk, c_in) tile

    # Recompute the k-slice of XW on the fly; the extra MXU work hides under
    # the adjacency DMA (kernel is HBM-bound). bf16 cast matches the reference.
    xw = jnp.dot(x_tile, w_ref[...], preferred_element_type=jnp.float32)
    acc_ref[...] += jnp.dot(adj_ref[...], xw.astype(jnp.bfloat16),
                            preferred_element_type=jnp.float32)

    @pl.when(k == pl.num_programs(1) - 1)
    def _():
        out = acc_ref[...] + b_ref[...]
        if apply_relu:
            out = jnp.maximum(out, 0.0)
        o_ref[...] = out.astype(o_ref.dtype)


def fused_gcn_layer(adj_p, x_p, w_p, b_p, *, apply_relu, out_dtype, plan):
    n_p = adj_p.shape[0]
    c_in_p = x_p.shape[1]
    c_out_p = w_p.shape[1]
    tm, tk = plan["tm"], plan["tk"]
    x_resident = plan["x_resident"]
    grid = (n_p // tm, n_p // tk)

    adj_spec = _make_adj_spec(tm, tk, plan["adj_bufs"])
    if x_resident:
        x_spec = pl.BlockSpec((n_p, c_in_p), lambda i, k: (0, 0))   # single DMA
    else:
        x_spec = pl.BlockSpec((tk, c_in_p), lambda i, k: (k, 0))

    out_itemsize = jnp.dtype(out_dtype).itemsize
    x_bytes = x_p.size * x_p.dtype.itemsize
    cost = pl.CostEstimate(
        flops=2 * n_p * n_p * c_out_p + 2 * grid[0] * n_p * c_in_p * c_out_p,
        transcendentals=0,
        bytes_accessed=(n_p * n_p * adj_p.dtype.itemsize
                        + (x_bytes if x_resident else grid[0] * x_bytes)
                        + w_p.size * w_p.dtype.itemsize
                        + n_p * c_out_p * out_itemsize),
    )

    kernel = functools.partial(_fused_gcn_kernel, apply_relu=apply_relu,
                               tk=tk, x_resident=x_resident)
    return pl.pallas_call(
        kernel,
        out_shape=jax.ShapeDtypeStruct((n_p, c_out_p), out_dtype),
        grid_spec=pltpu.PrefetchScalarGridSpec(
            num_scalar_prefetch=0,
            grid=grid,
            in_specs=[
                adj_spec,                                            # A_hat tiles
                x_spec,                                              # X (resident / streamed)
                pl.BlockSpec((c_in_p, c_out_p), lambda i, k: (0, 0)),  # W resident
                pl.BlockSpec((1, c_out_p), lambda i, k: (0, 0)),       # bias
            ],
            out_specs=pl.BlockSpec((tm, c_out_p), lambda i, k: (i, 0)),
            scratch_shapes=[pltpu.VMEM((tm, c_out_p), jnp.float32)],
        ),
        compiler_params=pltpu.CompilerParams(
            dimension_semantics=("parallel", "arbitrary"),
            vmem_limit_bytes=plan["vmem_limit"],
        ),
        cost_estimate=cost,
    )(adj_p, x_p, w_p, b_p)


# ----------------------------------------------------------------------------
# graph glue (plain JAX, outside the kernels)
# ----------------------------------------------------------------------------
def _normalized_adjacency_padded(edge_index, num_nodes, n_pad):
    """GCN-normalized adjacency with self loops, scattered directly into the
    zero-padded bf16 [n_pad, n_pad] buffer (single N^2 materialization).
    Duplicate edges accumulate weight (multigraph sum-aggregation).
    # TODO(synk): pre-existing self loops add on top of the inserted identity;
    # PyG's add_remaining_self_loops would skip nodes that already have one.
    """
    src = edge_index[0].astype(jnp.int32)
    dst = edge_index[1].astype(jnp.int32)
    loops = jnp.arange(num_nodes, dtype=jnp.int32)
    all_src = jnp.concatenate([src, loops])
    all_dst = jnp.concatenate([dst, loops])
    deg = jnp.zeros((num_nodes,), jnp.float32).at[all_dst].add(1.0)
    dinv = jax.lax.rsqrt(deg)                       # deg >= 1 (self loops)
    w = (dinv[all_dst] * dinv[all_src]).astype(jnp.bfloat16)
    adj = jnp.zeros((n_pad, n_pad), jnp.bfloat16)
    return adj.at[all_dst, all_src].add(w)          # message src -> dst


def _prepare_padded_operands(x, edge_index, params):
    n, c_in = x.shape
    c_hid = params["w1"].shape[1]
    c_out = params["w2"].shape[1]

    n_p = _round_up(n, 128)
    c_in_p = _round_up(c_in, 128)
    c_hid_p = _round_up(c_hid, 128)
    c_out_p = _round_up(c_out, 128)

    # TODO(synk): dense bf16 N_p^2 adjacency caps out around N~85-90k on v5e's
    # 16 GiB HBM; switch to a CSR/scalar-prefetch gather formulation past that.
    adj_p = _normalized_adjacency_padded(edge_index, n, n_p)
    x_p = jnp.zeros((n_p, c_in_p), jnp.bfloat16).at[:n, :c_in].set(
        x.astype(jnp.bfloat16))
    w1_p = jnp.zeros((c_in_p, c_hid_p), jnp.bfloat16).at[:c_in, :c_hid].set(
        params["w1"].astype(jnp.bfloat16))
    b1_p = jnp.zeros((1, c_hid_p), jnp.float32).at[0, :c_hid].set(params["b1"])
    w2_p = jnp.zeros((c_hid_p, c_out_p), jnp.bfloat16).at[:c_hid, :c_out].set(
        params["w2"].astype(jnp.bfloat16))
    b2_p = jnp.zeros((1, c_out_p), jnp.float32).at[0, :c_out].set(params["b2"])

    dims = (n, n_p, c_in_p, c_hid_p, c_out_p, c_out)
    return adj_p, x_p, (w1_p, b1_p), (w2_p, b2_p), dims


def link_prediction_forward(x, edge_index, params):
    """Equivalent of LinkPredictionModel.forward(x, edge_index)."""
    adj_p, x_p, (w1_p, b1_p), (w2_p, b2_p), dims = _prepare_padded_operands(
        x, edge_index, params)
    n, n_p, c_in_p, c_hid_p, c_out_p, c_out = dims

    plan = _plan(n_p,
                 c_in_max_p=max(c_in_p, c_hid_p),
                 c_out_max_p=max(c_hid_p, c_out_p),
                 out_itemsize_max=4)

    h_p = fused_gcn_layer(adj_p, x_p, w1_p, b1_p, apply_relu=True,
                          out_dtype=jnp.bfloat16, plan=plan)
    # Final layer kept in f32 to preserve embedding precision for decode();
    # switch to bf16 if the downstream decoder tolerates it (halves writeback).
    z_p = fused_gcn_layer(adj_p, h_p, w2_p, b2_p, apply_relu=False,
                          out_dtype=jnp.float32, plan=plan)
    return z_p[:n, :c_out]


def init_params(key, in_channels, hidden_channels, out_channels):
    k1, k2 = jax.random.split(key)

    def glorot(k, fan_in, fan_out):
        limit = jnp.sqrt(6.0 / (fan_in + fan_out))
        return jax.random.uniform(k, (fan_in, fan_out), jnp.float32, -limit, limit)

    return {
        "w1": glorot(k1, in_channels, hidden_channels),
        "b1": jnp.zeros((hidden_channels,), jnp.float32),
        "w2": glorot(k2, hidden_channels, out_channels),
        "b2": jnp.zeros((out_channels,), jnp.float32),
    }


# ----------------------------------------------------------------------------
# pure-JAX reference with the same padding / bf16 cast points (f32 accumulation)
# ----------------------------------------------------------------------------
def _ref_forward(x, edge_index, params):
    adj_p, x_p, (w1_p, b1_p), (w2_p, b2_p), dims = _prepare_padded_operands(
        x, edge_index, params)
    n, _, _, _, _, c_out = dims
    adj_f = adj_p.astype(jnp.float32)

    def layer(h_p, w_p, b_p, relu, out_dtype):
        xw = jnp.dot(h_p.astype(jnp.float32), w_p.astype(jnp.float32))
        xw = xw.astype(jnp.bfloat16).astype(jnp.float32)
        out = jnp.dot(adj_f, xw) + b_p
        if relu:
            out = jnp.maximum(out, 0.0)
        return out.astype(out_dtype)

    h = layer(x_p, w1_p, b1_p, True, jnp.bfloat16)
    z = layer(h, w2_p, b2_p, False, jnp.float32)
    return z[:n, :c_out]


if __name__ == "__main__":
    key = jax.random.PRNGKey(0)
    kx, ke, kp = jax.random.split(key, 3)

    num_nodes = 16
    in_channels, hidden_channels, out_channels = 8, 32, 16
    num_edges = 40

    x = jax.random.normal(kx, (num_nodes, in_channels), jnp.float32)
    edge_index = jax.random.randint(ke, (2, num_edges), 0, num_nodes, jnp.int32)
    params = init_params(kp, in_channels, hidden_channels, out_channels)

    fwd = jax.jit(link_prediction_forward)
    z = jax.block_until_ready(fwd(x, edge_index, params))

    z_ref = _ref_forward(x, edge_index, params)
    assert z.shape == (num_nodes, out_channels)
    max_err = float(jnp.max(jnp.abs(z - z_ref)))
    assert jnp.allclose(z, z_ref, atol=1e-2, rtol=1e-2), max_err

    print("KERNEL_OK")
</pallas_src>

<mosaic_0001>
module attributes {stable_mosaic.version = 11 : i64} {
  func.func @_fused_gcn_kernel(%arg0: i32, %arg1: i32, %arg2: memref<64x128xbf16, #tpu.memory_space<vmem>>, %arg3: memref<128x128xbf16, #tpu.memory_space<vmem>>, %arg4: memref<128x128xbf16, #tpu.memory_space<vmem>>, %arg5: memref<1x128xf32, #tpu.memory_space<vmem>>, %arg6: memref<64x128xbf16, #tpu.memory_space<vmem>>, %arg7: memref<64x128xf32, #tpu.memory_space<vmem>>) attributes {dimension_semantics = [#tpu.dimension_semantics<parallel>, #tpu.dimension_semantics<arbitrary>], iteration_bounds = array<i64: 2, 1>, scalar_prefetch = 0 : i64, scratch_operands = 1 : i64, tpu.core_type = #tpu.core_type<tc>, window_params = [{transform_indices = @transform_0, window_bounds = array<i64: 64, 128>}, {pipeline_mode = #tpu.pipeline_mode<synchronous>, transform_indices = @transform_1, window_bounds = array<i64: 128, 128>}, {pipeline_mode = #tpu.pipeline_mode<synchronous>, transform_indices = @transform_2, window_bounds = array<i64: 128, 128>}, {pipeline_mode = #tpu.pipeline_mode<synchronous>, transform_indices = @transform_3, window_bounds = array<i64: 1, 128>}, {transform_indices = @transform_4, window_bounds = array<i64: 64, 128>}]} {
    %c0_i32 = arith.constant 0 : i32
    %0 = arith.cmpi eq, %arg1, %c0_i32 : i32
    %1 = arith.extui %0 : i1 to i32
    %c0_i32_0 = arith.constant 0 : i32
    %2 = arith.cmpi ne, %1, %c0_i32_0 : i32
    scf.if %2 {
      %cst_12 = arith.constant 0.000000e+00 : f32
      %18 = vector.broadcast %cst_12 : f32 to vector<64x128xf32>
      %c0_13 = arith.constant 0 : index
      %c0_14 = arith.constant 0 : index
      %19 = vector.load %arg7[%c0_13, %c0_14] : memref<64x128xf32, #tpu.memory_space<vmem>>, vector<64x128xf32>
      tpu.vector_store %arg7[%c0_13, %c0_14], %18 {strides = array<i32>} : memref<64x128xf32, #tpu.memory_space<vmem>>, vector<64x128xf32>,
    } else {
    }
    %c128_i32 = arith.constant 128 : i32
    %3 = arith.muli %arg1, %c128_i32 : i32
    %4 = tpu.assume_multiple %3, 128 : i32
    %5 = arith.index_cast %4 : i32 to index
    %c0 = arith.constant 0 : index
    %6 = vector.load %arg3[%5, %c0] : memref<128x128xbf16, #tpu.memory_space<vmem>>, vector<128x128xbf16>
    %c0_1 = arith.constant 0 : index
    %c0_2 = arith.constant 0 : index
    %7 = vector.load %arg4[%c0_1, %c0_2] : memref<128x128xbf16, #tpu.memory_space<vmem>>, vector<128x128xbf16>
    %cst = arith.constant dense<0.000000e+00> : vector<128x128xf32>
    %8 = tpu.matmul %6, %7, %cst {dimension_numbers = #tpu.dot_dimension_numbers<[1], [0], [0], [1], [0, 0, 1, 1], [], []>} : vector<128x128xbf16>, vector<128x128xbf16>, vector<128x128xf32> -> vector<128x128xf32>
    %c0_3 = arith.constant 0 : index
    %c0_4 = arith.constant 0 : index
    %9 = vector.load %arg7[%c0_3, %c0_4] : memref<64x128xf32, #tpu.memory_space<vmem>>, vector<64x128xf32>
    %c0_5 = arith.constant 0 : index
    %c0_6 = arith.constant 0 : index
    %10 = vector.load %arg2[%c0_5, %c0_6] : memref<64x128xbf16, #tpu.memory_space<vmem>>, vector<64x128xbf16>
    %11 = arith.truncf %8 : vector<128x128xf32> to vector<128x128xbf16>
    %cst_7 = arith.constant dense<0.000000e+00> : vector<64x128xf32>
    %12 = tpu.matmul %10, %11, %cst_7 {dimension_numbers = #tpu.dot_dimension_numbers<[1], [0], [0], [1], [0, 0, 1, 1], [], []>} : vector<64x128xbf16>, vector<128x128xbf16>, vector<64x128xf32> -> vector<64x128xf32>
    %13 = arith.addf %9, %12 : vector<64x128xf32>
    %c0_8 = arith.constant 0 : index
    %c0_9 = arith.constant 0 : index
    %14 = vector.load %arg7[%c0_8, %c0_9] : memref<64x128xf32, #tpu.memory_space<vmem>>, vector<64x128xf32>
    tpu.vector_store %arg7[%c0_8, %c0_9], %13 {strides = array<i32>} : memref<64x128xf32, #tpu.memory_space<vmem>>, vector<64x128xf32>,
    %c0_i32_10 = arith.constant 0 : i32
    %15 = arith.cmpi eq, %arg1, %c0_i32_10 : i32
    %16 = arith.extui %15 : i1 to i32
    %c0_i32_11 = arith.constant 0 : i32
    %17 = arith.cmpi ne, %16, %c0_i32_11 : i32
    scf.if %17 {
      %c0_12 = arith.constant 0 : index
      %c0_13 = arith.constant 0 : index
      %18 = vector.load %arg7[%c0_12, %c0_13] : memref<64x128xf32, #tpu.memory_space<vmem>>, vector<64x128xf32>
      %c0_14 = arith.constant 0 : index
      %c0_15 = arith.constant 0 : index
      %19 = vector.load %arg5[%c0_14, %c0_15] : memref<1x128xf32, #tpu.memory_space<vmem>>, vector<1x128xf32>
      %20 = vector.broadcast %19 : vector<1x128xf32> to vector<64x128xf32>
      %21 = arith.addf %18, %20 : vector<64x128xf32>
      %cst_16 = arith.constant 0.000000e+00 : f32
      %22 = vector.broadcast %cst_16 : f32 to vector<64x128xf32>
      %23 = arith.maximumf %21, %22 : vector<64x128xf32>
      %24 = arith.truncf %23 : vector<64x128xf32> to vector<64x128xbf16>
      %c0_17 = arith.constant 0 : index
      %c0_18 = arith.constant 0 : index
      %25 = vector.load %arg6[%c0_17, %c0_18] : memref<64x128xbf16, #tpu.memory_space<vmem>>, vector<64x128xbf16>
      tpu.vector_store %arg6[%c0_17, %c0_18], %24 {strides = array<i32>} : memref<64x128xbf16, #tpu.memory_space<vmem>>, vector<64x128xbf16>,
    } else {
    }
    return
  }
  func.func @transform_0(%arg0: i32, %arg1: i32) -> (i32, i32) {
    %c0_i32 = arith.constant 0 : i32
    return %arg0, %arg1 : i32, i32
  }
  func.func @transform_1(%arg0: i32, %arg1: i32) -> (i32, i32) {
    %c0_i32 = arith.constant 0 : i32
    %c0_i32_0 = arith.constant 0 : i32
    %c0_i32_1 = arith.constant 0 : i32
    return %c0_i32, %c0_i32_0 : i32, i32
  }
  func.func @transform_2(%arg0: i32, %arg1: i32) -> (i32, i32) {
    %c0_i32 = arith.constant 0 : i32
    %c0_i32_0 = arith.constant 0 : i32
    %c0_i32_1 = arith.constant 0 : i32
    return %c0_i32, %c0_i32_0 : i32, i32
  }
  func.func @transform_3(%arg0: i32, %arg1: i32) -> (i32, i32) {
    %c0_i32 = arith.constant 0 : i32
    %c0_i32_0 = arith.constant 0 : i32
    %c0_i32_1 = arith.constant 0 : i32
    return %c0_i32, %c0_i32_0 : i32, i32
  }
  func.func @transform_4(%arg0: i32, %arg1: i32) -> (i32, i32) {
    %c0_i32 = arith.constant 0 : i32
    %c0_i32_0 = arith.constant 0 : i32
    return %arg0, %c0_i32 : i32, i32
  }
}

module attributes {stable_mosaic.version = 11 : i64} {
  func.func @_fused_gcn_kernel(%arg0: i32, %arg1: i32, %arg2: memref<64x128xbf16, #tpu.memory_space<vmem>>, %arg3: memref<128x128xbf16, #tpu.memory_space<vmem>>, %arg4: memref<128x128xbf16, #tpu.memory_space<vmem>>, %arg5: memref<1x128xf32, #tpu.memory_space<vmem>>, %arg6: memref<64x128xf32, #tpu.memory_space<vmem>>, %arg7: memref<64x128xf32, #tpu.memory_space<vmem>>) attributes {dimension_semantics = [#tpu.dimension_semantics<parallel>, #tpu.dimension_semantics<arbitrary>], iteration_bounds = array<i64: 2, 1>, scalar_prefetch = 0 : i64, scratch_operands = 1 : i64, tpu.core_type = #tpu.core_type<tc>, window_params = [{transform_indices = @transform_0, window_bounds = array<i64: 64, 128>}, {pipeline_mode = #tpu.pipeline_mode<synchronous>, transform_indices = @transform_1, window_bounds = array<i64: 128, 128>}, {pipeline_mode = #tpu.pipeline_mode<synchronous>, transform_indices = @transform_2, window_bounds = array<i64: 128, 128>}, {pipeline_mode = #tpu.pipeline_mode<synchronous>, transform_indices = @transform_3, window_bounds = array<i64: 1, 128>}, {transform_indices = @transform_4, window_bounds = array<i64: 64, 128>}]} {
    %c0_i32 = arith.constant 0 : i32
    %0 = arith.cmpi eq, %arg1, %c0_i32 : i32
    %1 = arith.extui %0 : i1 to i32
    %c0_i32_0 = arith.constant 0 : i32
    %2 = arith.cmpi ne, %1, %c0_i32_0 : i32
    scf.if %2 {
      %cst_12 = arith.constant 0.000000e+00 : f32
      %18 = vector.broadcast %cst_12 : f32 to vector<64x128xf32>
      %c0_13 = arith.constant 0 : index
      %c0_14 = arith.constant 0 : index
      %19 = vector.load %arg7[%c0_13, %c0_14] : memref<64x128xf32, #tpu.memory_space<vmem>>, vector<64x128xf32>
      tpu.vector_store %arg7[%c0_13, %c0_14], %18 {strides = array<i32>} : memref<64x128xf32, #tpu.memory_space<vmem>>, vector<64x128xf32>,
    } else {
    }
    %c128_i32 = arith.constant 128 : i32
    %3 = arith.muli %arg1, %c128_i32 : i32
    %4 = tpu.assume_multiple %3, 128 : i32
    %5 = arith.index_cast %4 : i32 to index
    %c0 = arith.constant 0 : index
    %6 = vector.load %arg3[%5, %c0] : memref<128x128xbf16, #tpu.memory_space<vmem>>, vector<128x128xbf16>
    %c0_1 = arith.constant 0 : index
    %c0_2 = arith.constant 0 : index
    %7 = vector.load %arg4[%c0_1, %c0_2] : memref<128x128xbf16, #tpu.memory_space<vmem>>, vector<128x128xbf16>
    %cst = arith.constant dense<0.000000e+00> : vector<128x128xf32>
    %8 = tpu.matmul %6, %7, %cst {dimension_numbers = #tpu.dot_dimension_numbers<[1], [0], [0], [1], [0, 0, 1, 1], [], []>} : vector<128x128xbf16>, vector<128x128xbf16>, vector<128x128xf32> -> vector<128x128xf32>
    %c0_3 = arith.constant 0 : index
    %c0_4 = arith.constant 0 : index
    %9 = vector.load %arg7[%c0_3, %c0_4] : memref<64x128xf32, #tpu.memory_space<vmem>>, vector<64x128xf32>
    %c0_5 = arith.constant 0 : index
    %c0_6 = arith.constant 0 : index
    %10 = vector.load %arg2[%c0_5, %c0_6] : memref<64x128xbf16, #tpu.memory_space<vmem>>, vector<64x128xbf16>
    %11 = arith.truncf %8 : vector<128x128xf32> to vector<128x128xbf16>
    %cst_7 = arith.constant dense<0.000000e+00> : vector<64x128xf32>
    %12 = tpu.matmul %10, %11, %cst_7 {dimension_numbers = #tpu.dot_dimension_numbers<[1], [0], [0], [1], [0, 0, 1, 1], [], []>} : vector<64x128xbf16>, vector<128x128xbf16>, vector<64x128xf32> -> vector<64x128xf32>
    %13 = arith.addf %9, %12 : vector<64x128xf32>
    %c0_8 = arith.constant 0 : index
    %c0_9 = arith.constant 0 : index
    %14 = vector.load %arg7[%c0_8, %c0_9] : memref<64x128xf32, #tpu.memory_space<vmem>>, vector<64x128xf32>
    tpu.vector_store %arg7[%c0_8, %c0_9], %13 {strides = array<i32>} : memref<64x128xf32, #tpu.memory_space<vmem>>, vector<64x128xf32>,
    %c0_i32_10 = arith.constant 0 : i32
    %15 = arith.cmpi eq, %arg1, %c0_i32_10 : i32
    %16 = arith.extui %15 : i1 to i32
    %c0_i32_11 = arith.constant 0 : i32
    %17 = arith.cmpi ne, %16, %c0_i32_11 : i32
    scf.if %17 {
      %c0_12 = arith.constant 0 : index
      %c0_13 = arith.constant 0 : index
      %18 = vector.load %arg7[%c0_12, %c0_13] : memref<64x128xf32, #tpu.memory_space<vmem>>, vector<64x128xf32>
      %c0_14 = arith.constant 0 : index
      %c0_15 = arith.constant 0 : index
      %19 = vector.load %arg5[%c0_14, %c0_15] : memref<1x128xf32, #tpu.memory_space<vmem>>, vector<1x128xf32>
      %20 = vector.broadcast %19 : vector<1x128xf32> to vector<64x128xf32>
      %21 = arith.addf %18, %20 : vector<64x128xf32>
      %c0_16 = arith.constant 0 : index
      %c0_17 = arith.constant 0 : index
      %22 = vector.load %arg6[%c0_16, %c0_17] : memref<64x128xf32, #tpu.memory_space<vmem>>, vector<64x128xf32>
      tpu.vector_store %arg6[%c0_16, %c0_17], %21 {strides = array<i32>} : memref<64x128xf32, #tpu.memory_space<vmem>>, vector<64x128xf32>,
    } else {
    }
    return
  }
  func.func @transform_0(%arg0: i32, %arg1: i32) -> (i32, i32) {
    %c0_i32 = arith.constant 0 : i32
    return %arg0, %arg1 : i32, i32
  }
  func.func @transform_1(%arg0: i32, %arg1: i32) -> (i32, i32) {
    %c0_i32 = arith.constant 0 : i32
    %c0_i32_0 = arith.constant 0 : i32
    %c0_i32_1 = arith.constant 0 : i32
    return %c0_i32, %c0_i32_0 : i32, i32
  }
  func.func @transform_2(%arg0: i32, %arg1: i32) -> (i32, i32) {
    %c0_i32 = arith.constant 0 : i32
    %c0_i32_0 = arith.constant 0 : i32
    %c0_i32_1 = arith.constant 0 : i32
    return %c0_i32, %c0_i32_0 : i32, i32
  }
  func.func @transform_3(%arg0: i32, %arg1: i32) -> (i32, i32) {
    %c0_i32 = arith.constant 0 : i32
    %c0_i32_0 = arith.constant 0 : i32
    %c0_i32_1 = arith.constant 0 : i32
    return %c0_i32, %c0_i32_0 : i32, i32
  }
  func.func @transform_4(%arg0: i32, %arg1: i32) -> (i32, i32) {
    %c0_i32 = arith.constant 0 : i32
    %c0_i32_0 = arith.constant 0 : i32
    return %arg0, %c0_i32 : i32, i32
  }
}

</mosaic_0001>

<bundles_post_ra>
// kernel: link_prediction_forward.2
= control target key start
LH: loop header
LB: loop body
LE: loop exit
PB: predicated region body
PF: predicated region fallthrough
CT: control target
= control target key end

     0   :  { %s988_s15 = smov 0   ;;  %s990_s16 = smov 0   ;;  %s1088_s0 = inlined_call_operand.vmem [shape: bf16[128,128], index: 0, kind: input, shape index: {}]   ;;  %s1089_s1 = inlined_call_operand.vmem [shape: bf16[128,128], index: 1, kind: input, shape index: {}]   ;;  %s1090_s2 = inlined_call_operand.vmem [shape: bf16[128,128], index: 2, kind: input, shape index: {}]   ;;  %s1091_s3 = inlined_call_operand.vmem [shape: f32[1,128], index: 3, kind: input, shape index: {}]   ;;  %s1092_s4 = inlined_call_operand.vmem [shape: bf16[128,128], index: 4, kind: output, shape index: {}]  }
   0x1   :  { %s992_s17 = smov 0  }
   0x2 LB: > { %s26_s18 = sadd.s32 1, %s957_s16  ;;  %p744_p0 = scmp.ge.s32.totalorder %s961_s17, 1  ;;  %s961_s17 = sphi %s992_s17, %s14_s17   ;;  %s957_s16 = sphi %s990_s16, %s1094_s16   ;;  %s953_s15 = sphi %s988_s15, %s1093_s15  }
   0x3   : > { %p28_p1 = scmp.ge.s32.totalorder %s26_s18, 2  ;;  %p180_p2 = scmp.lt.s32.totalorder %s961_s17, 3 }
   0x5   : > { %s1096_s18 = smov (%p28_p1, %s26_s18), 0  ;;  %p181_p3 = pnand %p744_p0, %p180_p2 }
   0x6   : > { %v919_v0 = vld [vmem:[%s1090_s2] sm:$0xff] (!%p181_p3)   ;;  %v920_v1 = vld [vmem:[%s1090_s2 + $0x8] sm:$0xff] (!%p181_p3)   ;;  %v921_v2 = vld [vmem:[%s1090_s2 + $0x10] sm:$0xff] (!%p181_p3)   ;;  %s745_s29 = sshll.u32 (!%p181_p3), %s953_s15, 3 }
   0x7   : > { %184 = sbr.rel (%p181_p3) target bundleno = 518 (0x206), region = 36  ;;  %839 = vmatprep.subr.bf16.mxu0 (!%p181_p3), %v919_v0  ;;  %v922_v3 = vld [vmem:[%s1090_s2 + $0x18] sm:$0xff] (!%p181_p3)   ;;  %v927_v4 = vld [vmem:[%s1089_s1] sm:$0xff] (!%p181_p3)   ;;  %v924_v6 = vld [vmem:[%s1090_s2 + $0x28] sm:$0xff] (!%p181_p3)   ;;  %p210_p4 = scmp.lt.s32.totalorder (!%p181_p3), %s745_s29, 15 }
   0x8   : > { %840 = vmatpush3.bf16.msra.mxu0 (!%p181_p3), %v919_v0  ;;  %855 = vmatprep.mubr.bf16.mxu0 (!%p181_p3), %v927_v4  ;;  %v923_v5 = vld [vmem:[%s1090_s2 + $0x20] sm:$0xff] (!%p181_p3)   ;;  %v925_v7 = vld [vmem:[%s1090_s2 + $0x30] sm:$0xff] (!%p181_p3)   ;;  %v926_v8 = vld [vmem:[%s1090_s2 + $0x38] sm:$0xff] (!%p181_p3)  }
   0x9   : > { %841 = vmatprep.subr.bf16.mxu0 (!%p181_p3), %v920_v1  ;;  %v928_v9 = vld [vmem:[%s1089_s1 + $0x8] sm:$0xff] (!%p181_p3)   ;;  %v929_v10 = vld [vmem:[%s1089_s1 + $0x10] sm:$0xff] (!%p181_p3)   ;;  %v930_v11 = vld [vmem:[%s1089_s1 + $0x18] sm:$0xff] (!%p181_p3)  }
   0xa   : > { %v931_v12 = vld [vmem:[%s1089_s1 + $0x20] sm:$0xff] (!%p181_p3)   ;;  %v932_v13 = vld [vmem:[%s1089_s1 + $0x28] sm:$0xff] (!%p181_p3)   ;;  %v933_v14 = vld [vmem:[%s1089_s1 + $0x30] sm:$0xff] (!%p181_p3)  }
   0xb   : > { %v934_v15 = vld [vmem:[%s1089_s1 + $0x38] sm:$0xff] (!%p181_p3)   ;;  %v769_v44 = vld [vmem:[%s1091_s3] ss:$0 sm:$0xff] (!%p181_p3) }
   0xc   : > { %842 = vmatpush3.bf16.msra.mxu0 (!%p181_p3), %v920_v1 }
   0xd   : > { %843 = vmatprep.subr.bf16.mxu0 (!%p181_p3), %v921_v2 }
   0xe   : > { %s1098_s29 = smov (!%p210_p4, %s745_s29), 15 }
   0xf   : > { %s746_s30 = sshll.u32 %s1098_s29, 2 }
  0x10   : > { %844 = vmatpush3.bf16.msra.mxu0 %v921_v2  ;;  %s1065_s7 = scalar_lea.vmem %s1088_s0, %s746_s30  ;;  %s222_s11 = scalar_lea.vmem %s1092_s4, %s746_s30 }
  0x11   : > { %845 = vmatprep.subr.bf16.mxu0 %v922_v3  ;;  %v935_v16 = vld [vmem:[%s1065_s7] sm:$0xff]   ;;  %v936_v41 = vld [vmem:[%s1065_s7 + $0x8] sm:$0xff]   ;;  %v937_v42 = vld [vmem:[%s1065_s7 + $0x10] sm:$0xff]  }
  0x12   : > { %887 = vmatprep.mubr.bf16.mxu1 %v935_v16  ;;  %v938_v43 = vld [vmem:[%s1065_s7 + $0x18] sm:$0xff]  }
  0x14   : > { %846 = vmatpush3.bf16.msra.mxu0 %v922_v3 }
  0x15   : > { %847 = vmatprep.subr.bf16.mxu0 %v923_v5 }
  0x18   : > { %848 = vmatpush3.bf16.msra.mxu0 %v923_v5 }
  0x19   : > { %849 = vmatprep.subr.bf16.mxu0 %v924_v6 }
  0x1c   : > { %850 = vmatpush3.bf16.msra.mxu0 %v924_v6 }
  0x1d   : > { %851 = vmatprep.subr.bf16.mxu0 %v925_v7 }
  0x20   : > { %852 = vmatpush3.bf16.msra.mxu0 %v925_v7 }
  0x21   : > { %853 = vmatprep.subr.bf16.mxu0 %v926_v8 }
  0x24   : > { %854 = vmatpush3.bf16.msra.mxu0 %v926_v8 }
  0x27   : > { %856 = vmatmul.mubr.bf16.vlgmr.msra.gmra.mrb[0].mxu0 %v928_v9 }
  0x28   : > { %859 = vmatprep.mubr.bf16.mxu0 %v929_v10 }
  0x2f   : > { %860 = vmatmul.mubr.bf16.gmra.mrb[4].mxu0 %v930_v11 }
  0x30   : > { %863 = vmatprep.mubr.bf16.mxu0 %v931_v12 }
  0x37   : > { %864 = vmatmul.mubr.bf16.gmra.mrb[8].mxu0 %v932_v13 }
  0x38   : > { %867 = vmatprep.mubr.bf16.mxu0 %v933_v14 }
  0x3f   : > { %868 = vmatmul.mubr.bf16.gmra.mrb[12].mxu0 %v934_v15 }
  0xfa   : > { %v857_v17 = vpop.f32.mrb[0].mxu0 }
  0xfb   : > { %v404_v18 = vpop.f32.mrb[1].mxu0 }
  0xfc   : > { %v858_v19 = vpop.f32.mrb[2].mxu0 }
  0xfd   : > { %v484_v20 = vpack.c.bf16 %v858_v19, %v857_v17  ;;  %v407_v21 = vpop.f32.mrb[3].mxu0 }
  0xfe   : > { %v483_v22 = vpack.c.bf16 %v407_v21, %v404_v18 }
 0x100   : > { %871 = vmatprep.subr.bf16.mxu1 %v483_v22 }
 0x101   : > { %872 = vmatpush3.bf16.msra.mxu1 %v483_v22 }
 0x102   : > { %v861_v23 = vpop.f32.mrb[4].mxu0  ;;  %873 = vmatprep.subr.bf16.mxu1 %v484_v20 }
 0x103   : > { %v420_v24 = vpop.f32.mrb[5].mxu0 }
 0x104   : > { %v862_v25 = vpop.f32.mrb[6].mxu0 }
 0x105   : > { %v486_v26 = vpack.c.bf16 %v862_v25, %v861_v23  ;;  %v423_v27 = vpop.f32.mrb[7].mxu0  ;;  %874 = vmatpush3.bf16.msra.mxu1 %v484_v20 }
 0x106   : > { %v485_v28 = vpack.c.bf16 %v423_v27, %v420_v24 }
 0x108   : > { %875 = vmatprep.subr.bf16.mxu1 %v485_v28 }
 0x109   : > { %876 = vmatpush3.bf16.msra.mxu1 %v485_v28 }
 0x10a   : > { %v865_v29 = vpop.f32.mrb[8].mxu0  ;;  %877 = vmatprep.subr.bf16.mxu1 %v486_v26 }
 0x10b   : > { %v436_v30 = vpop.f32.mrb[9].mxu0 }
 0x10c   : > { %v866_v31 = vpop.f32.mrb[10].mxu0 }
 0x10d   : > { %v488_v32 = vpack.c.bf16 %v866_v31, %v865_v29  ;;  %v439_v33 = vpop.f32.mrb[11].mxu0  ;;  %878 = vmatpush3.bf16.msra.mxu1 %v486_v26 }
 0x10e   : > { %v487_v34 = vpack.c.bf16 %v439_v33, %v436_v30 }
 0x110   : > { %879 = vmatprep.subr.bf16.mxu1 %v487_v34 }
 0x111   : > { %880 = vmatpush3.bf16.msra.mxu1 %v487_v34 }
 0x112   : > { %v869_v35 = vpop.f32.mrb[12].mxu0  ;;  %881 = vmatprep.subr.bf16.mxu1 %v488_v32 }
 0x113   : > { %v452_v36 = vpop.f32.mrb[13].mxu0 }
 0x114   : > { %v870_v37 = vpop.f32.mrb[14].mxu0 }
 0x115   : > { %v490_v38 = vpack.c.bf16 %v870_v37, %v869_v35  ;;  %v455_v39 = vpop.f32.mrb[15].mxu0  ;;  %882 = vmatpush3.bf16.msra.mxu1 %v488_v32 }
 0x116   : > { %v489_v40 = vpack.c.bf16 %v455_v39, %v452_v36 }
 0x118   : > { %883 = vmatprep.subr.bf16.mxu1 %v489_v40 }
 0x119   : > { %884 = vmatpush3.bf16.msra.mxu1 %v489_v40 }
 0x11a   : > { %885 = vmatprep.subr.bf16.mxu1 %v490_v38 }
 0x11d   : > { %886 = vmatpush3.bf16.msra.mxu1 %v490_v38 }
 0x120   : > { %888 = vmatmul.mubr.bf16.vlgmr.msra.gmra.mrb[0].mxu1 %v936_v41 }
 0x121   : > { %891 = vmatprep.mubr.bf16.mxu1 %v937_v42 }
 0x128   : > { %892 = vmatmul.mubr.bf16.gmra.mrb[4].mxu1 %v938_v43 }
 0x1f3   : > { %v889_v45 = vpop.f32.mrb[0].mxu1 }
 0x1f4   : > { %v616_v46 = vadd.f32 %v889_v45, %v769_v44  ;;  %v549_v47 = vpop.f32.mrb[1].mxu1 }
 0x1f5   : > { %v614_v48 = vadd.f32 %v769_v44, %v549_v47  ;;  %v890_v49 = vpop.f32.mrb[2].mxu1 }
 0x1f6   : > { %v617_v50 = vadd.f32 %v890_v49, %v769_v44  ;;  %v552_v51 = vpop.f32.mrb[3].mxu1  ;;  %v624_v53 = vmax.f32 %v616_v46, 0.0 }
 0x1f7   : > { %v615_v52 = vadd.f32 %v769_v44, %v552_v51  ;;  %v622_v55 = vmax.f32 %v614_v48, 0.0 }
 0x1f8   : > { %v625_v54 = vmax.f32 %v617_v50, 0.0 }
 0x1f9   : > { %v623_v56 = vmax.f32 %v615_v52, 0.0 }
 0x1fa   : > { %v796_v57 = vpack.c.bf16 %v625_v54, %v624_v53 }
 0x1fb   : > { %v791_v58 = vpack.c.bf16 %v623_v56, %v622_v55  ;;  %v893_v59 = vpop.f32.mrb[4].mxu1 }
 0x1fc   : > { %808 = vst [vmem:[%s222_s11 + $0x8] sm:$0xff] %v796_v57   ;;  %v620_v60 = vadd.f32 %v893_v59, %v769_v44  ;;  %v565_v61 = vpop.f32.mrb[5].mxu1 }
 0x1fd   : > { %792 = vst [vmem:[%s222_s11] sm:$0xff] %v791_v58   ;;  %v618_v62 = vadd.f32 %v769_v44, %v565_v61  ;;  %v894_v63 = vpop.f32.mrb[6].mxu1 }
 0x1fe   : > { %v621_v0 = vadd.f32 %v894_v63, %v769_v44  ;;  %v568_v1 = vpop.f32.mrb[7].mxu1  ;;  %v628_v3 = vmax.f32 %v620_v60, 0.0 }
 0x1ff   : > { %v619_v2 = vadd.f32 %v769_v44, %v568_v1  ;;  %v626_v5 = vmax.f32 %v618_v62, 0.0 }
 0x200   : > { %v629_v4 = vmax.f32 %v621_v0, 0.0 }
 0x201   : > { %v627_v6 = vmax.f32 %v619_v2, 0.0 }
 0x202   : > { %v806_v7 = vpack.c.bf16 %v629_v4, %v628_v3 }
 0x203   : > { %v801_v8 = vpack.c.bf16 %v627_v6, %v626_v5 }
 0x204   : > { %810 = vst [vmem:[%s222_s11 + $0x18] sm:$0xff] %v806_v7  }
 0x205   : > { %809 = vst [vmem:[%s222_s11 + $0x10] sm:$0xff] %v801_v8  }
 0x206 PF: > { %s14_s17 = sadd.s32 1, %s961_s17   ;;  %s1093_s15 = smov %s957_s16 }
 0x207   : > { %p11_p5 = scmp.ge.s32.totalorder %s14_s17, 4   ;;  %s1094_s16 = smov %s1096_s18 }
 0x209   :  { %13 = sbr.rel (!%p11_p5) target bundleno = 2 (0x2), region = 75 }

// kernel: link_prediction_forward.3
= control target key start
LH: loop header
LB: loop body
LE: loop exit
PB: predicated region body
PF: predicated region fallthrough
CT: control target
= control target key end

     0   :  { %s909_s15 = smov 0   ;;  %s911_s16 = smov 0   ;;  %s1006_s0 = inlined_call_operand.vmem [shape: bf16[128,128], index: 0, kind: input, shape index: {}]   ;;  %s1007_s1 = inlined_call_operand.vmem [shape: bf16[128,128], index: 1, kind: input, shape index: {}]   ;;  %s1008_s2 = inlined_call_operand.vmem [shape: bf16[128,128], index: 2, kind: input, shape index: {}]   ;;  %s1009_s3 = inlined_call_operand.vmem [shape: f32[1,128], index: 3, kind: input, shape index: {}]   ;;  %s1010_s4 = inlined_call_operand.vmem [shape: f32[128,128], index: 4, kind: output, shape index: {}]  }
   0x1   :  { %s913_s17 = smov 0  }
   0x2 LB: > { %s26_s18 = sadd.s32 1, %s878_s16  ;;  %p704_p0 = scmp.ge.s32.totalorder %s882_s17, 1  ;;  %s882_s17 = sphi %s913_s17, %s14_s17   ;;  %s878_s16 = sphi %s911_s16, %s1012_s16   ;;  %s874_s15 = sphi %s909_s15, %s1011_s15  }
   0x3   : > { %p28_p1 = scmp.ge.s32.totalorder %s26_s18, 2  ;;  %p180_p2 = scmp.lt.s32.totalorder %s882_s17, 3 }
   0x5   : > { %s1014_s18 = smov (%p28_p1, %s26_s18), 0  ;;  %p181_p3 = pnand %p704_p0, %p180_p2 }
   0x6   : > { %v840_v0 = vld [vmem:[%s1008_s2] sm:$0xff] (!%p181_p3)   ;;  %v841_v1 = vld [vmem:[%s1008_s2 + $0x8] sm:$0xff] (!%p181_p3)   ;;  %v842_v2 = vld [vmem:[%s1008_s2 + $0x10] sm:$0xff] (!%p181_p3)   ;;  %s705_s29 = sshll.u32 (!%p181_p3), %s874_s15, 3 }
   0x7   : > { %184 = sbr.rel (%p181_p3) target bundleno = 514 (0x202), region = 36  ;;  %760 = vmatprep.subr.bf16.mxu0 (!%p181_p3), %v840_v0  ;;  %v843_v3 = vld [vmem:[%s1008_s2 + $0x18] sm:$0xff] (!%p181_p3)   ;;  %v848_v4 = vld [vmem:[%s1007_s1] sm:$0xff] (!%p181_p3)   ;;  %v845_v6 = vld [vmem:[%s1008_s2 + $0x28] sm:$0xff] (!%p181_p3)   ;;  %p210_p4 = scmp.lt.s32.totalorder (!%p181_p3), %s705_s29, 15 }
   0x8   : > { %761 = vmatpush3.bf16.msra.mxu0 (!%p181_p3), %v840_v0  ;;  %776 = vmatprep.mubr.bf16.mxu0 (!%p181_p3), %v848_v4  ;;  %v844_v5 = vld [vmem:[%s1008_s2 + $0x20] sm:$0xff] (!%p181_p3)   ;;  %v846_v7 = vld [vmem:[%s1008_s2 + $0x30] sm:$0xff] (!%p181_p3)   ;;  %v847_v8 = vld [vmem:[%s1008_s2 + $0x38] sm:$0xff] (!%p181_p3)  }
   0x9   : > { %762 = vmatprep.subr.bf16.mxu0 (!%p181_p3), %v841_v1  ;;  %v849_v9 = vld [vmem:[%s1007_s1 + $0x8] sm:$0xff] (!%p181_p3)   ;;  %v850_v10 = vld [vmem:[%s1007_s1 + $0x10] sm:$0xff] (!%p181_p3)   ;;  %v851_v11 = vld [vmem:[%s1007_s1 + $0x18] sm:$0xff] (!%p181_p3)  }
   0xa   : > { %v852_v12 = vld [vmem:[%s1007_s1 + $0x20] sm:$0xff] (!%p181_p3)   ;;  %v853_v13 = vld [vmem:[%s1007_s1 + $0x28] sm:$0xff] (!%p181_p3)   ;;  %v854_v14 = vld [vmem:[%s1007_s1 + $0x30] sm:$0xff] (!%p181_p3)  }
   0xb   : > { %v855_v15 = vld [vmem:[%s1007_s1 + $0x38] sm:$0xff] (!%p181_p3)   ;;  %v729_v44 = vld [vmem:[%s1009_s3] ss:$0 sm:$0xff] (!%p181_p3) }
   0xc   : > { %763 = vmatpush3.bf16.msra.mxu0 (!%p181_p3), %v841_v1 }
   0xd   : > { %764 = vmatprep.subr.bf16.mxu0 (!%p181_p3), %v842_v2 }
   0xe   : > { %s1016_s29 = smov (!%p210_p4, %s705_s29), 15 }
   0xf   : > { %s706_s30 = sshll.u32 %s1016_s29, 2  ;;  %s708_s15 = sshll.u32 %s1016_s29, 3 }
  0x10   : > { %765 = vmatpush3.bf16.msra.mxu0 %v842_v2  ;;  %s984_s7 = scalar_lea.vmem %s1006_s0, %s706_s30  ;;  %s222_s12 = scalar_lea.vmem %s1010_s4, %s708_s15 }
  0x11   : > { %766 = vmatprep.subr.bf16.mxu0 %v843_v3  ;;  %v856_v16 = vld [vmem:[%s984_s7] sm:$0xff]   ;;  %v857_v41 = vld [vmem:[%s984_s7 + $0x8] sm:$0xff]   ;;  %v858_v42 = vld [vmem:[%s984_s7 + $0x10] sm:$0xff]  }
  0x12   : > { %808 = vmatprep.mubr.bf16.mxu1 %v856_v16  ;;  %v859_v43 = vld [vmem:[%s984_s7 + $0x18] sm:$0xff]  }
  0x14   : > { %767 = vmatpush3.bf16.msra.mxu0 %v843_v3 }
  0x15   : > { %768 = vmatprep.subr.bf16.mxu0 %v844_v5 }
  0x18   : > { %769 = vmatpush3.bf16.msra.mxu0 %v844_v5 }
  0x19   : > { %770 = vmatprep.subr.bf16.mxu0 %v845_v6 }
  0x1c   : > { %771 = vmatpush3.bf16.msra.mxu0 %v845_v6 }
  0x1d   : > { %772 = vmatprep.subr.bf16.mxu0 %v846_v7 }
  0x20   : > { %773 = vmatpush3.bf16.msra.mxu0 %v846_v7 }
  0x21   : > { %774 = vmatprep.subr.bf16.mxu0 %v847_v8 }
  0x24   : > { %775 = vmatpush3.bf16.msra.mxu0 %v847_v8 }
  0x27   : > { %777 = vmatmul.mubr.bf16.vlgmr.msra.gmra.mrb[0].mxu0 %v849_v9 }
  0x28   : > { %780 = vmatprep.mubr.bf16.mxu0 %v850_v10 }
  0x2f   : > { %781 = vmatmul.mubr.bf16.gmra.mrb[4].mxu0 %v851_v11 }
  0x30   : > { %784 = vmatprep.mubr.bf16.mxu0 %v852_v12 }
  0x37   : > { %785 = vmatmul.mubr.bf16.gmra.mrb[8].mxu0 %v853_v13 }
  0x38   : > { %788 = vmatprep.mubr.bf16.mxu0 %v854_v14 }
  0x3f   : > { %789 = vmatmul.mubr.bf16.gmra.mrb[12].mxu0 %v855_v15 }
  0xfa   : > { %v778_v17 = vpop.f32.mrb[0].mxu0 }
  0xfb   : > { %v404_v18 = vpop.f32.mrb[1].mxu0 }
  0xfc   : > { %v779_v19 = vpop.f32.mrb[2].mxu0 }
  0xfd   : > { %v484_v20 = vpack.c.bf16 %v779_v19, %v778_v17  ;;  %v407_v21 = vpop.f32.mrb[3].mxu0 }
  0xfe   : > { %v483_v22 = vpack.c.bf16 %v407_v21, %v404_v18 }
 0x100   : > { %792 = vmatprep.subr.bf16.mxu1 %v483_v22 }
 0x101   : > { %793 = vmatpush3.bf16.msra.mxu1 %v483_v22 }
 0x102   : > { %v782_v23 = vpop.f32.mrb[4].mxu0  ;;  %794 = vmatprep.subr.bf16.mxu1 %v484_v20 }
 0x103   : > { %v420_v24 = vpop.f32.mrb[5].mxu0 }
 0x104   : > { %v783_v25 = vpop.f32.mrb[6].mxu0 }
 0x105   : > { %v486_v26 = vpack.c.bf16 %v783_v25, %v782_v23  ;;  %v423_v27 = vpop.f32.mrb[7].mxu0  ;;  %795 = vmatpush3.bf16.msra.mxu1 %v484_v20 }
 0x106   : > { %v485_v28 = vpack.c.bf16 %v423_v27, %v420_v24 }
 0x108   : > { %796 = vmatprep.subr.bf16.mxu1 %v485_v28 }
 0x109   : > { %797 = vmatpush3.bf16.msra.mxu1 %v485_v28 }
 0x10a   : > { %v786_v29 = vpop.f32.mrb[8].mxu0  ;;  %798 = vmatprep.subr.bf16.mxu1 %v486_v26 }
 0x10b   : > { %v436_v30 = vpop.f32.mrb[9].mxu0 }
 0x10c   : > { %v787_v31 = vpop.f32.mrb[10].mxu0 }
 0x10d   : > { %v488_v32 = vpack.c.bf16 %v787_v31, %v786_v29  ;;  %v439_v33 = vpop.f32.mrb[11].mxu0  ;;  %799 = vmatpush3.bf16.msra.mxu1 %v486_v26 }
 0x10e   : > { %v487_v34 = vpack.c.bf16 %v439_v33, %v436_v30 }
 0x110   : > { %800 = vmatprep.subr.bf16.mxu1 %v487_v34 }
 0x111   : > { %801 = vmatpush3.bf16.msra.mxu1 %v487_v34 }
 0x112   : > { %v790_v35 = vpop.f32.mrb[12].mxu0  ;;  %802 = vmatprep.subr.bf16.mxu1 %v488_v32 }
 0x113   : > { %v452_v36 = vpop.f32.mrb[13].mxu0 }
 0x114   : > { %v791_v37 = vpop.f32.mrb[14].mxu0 }
 0x115   : > { %v490_v38 = vpack.c.bf16 %v791_v37, %v790_v35  ;;  %v455_v39 = vpop.f32.mrb[15].mxu0  ;;  %803 = vmatpush3.bf16.msra.mxu1 %v488_v32 }
 0x116   : > { %v489_v40 = vpack.c.bf16 %v455_v39, %v452_v36 }
 0x118   : > { %804 = vmatprep.subr.bf16.mxu1 %v489_v40 }
 0x119   : > { %805 = vmatpush3.bf16.msra.mxu1 %v489_v40 }
 0x11a   : > { %806 = vmatprep.subr.bf16.mxu1 %v490_v38 }
 0x11d   : > { %807 = vmatpush3.bf16.msra.mxu1 %v490_v38 }
 0x120   : > { %809 = vmatmul.mubr.bf16.vlgmr.msra.gmra.mrb[0].mxu1 %v857_v41 }
 0x121   : > { %812 = vmatprep.mubr.bf16.mxu1 %v858_v42 }
 0x128   : > { %813 = vmatmul.mubr.bf16.gmra.mrb[4].mxu1 %v859_v43 }
 0x1f3   : > { %v810_v45 = vpop.f32.mrb[0].mxu1 }
 0x1f4   : > { %v616_v46 = vadd.f32 %v810_v45, %v729_v44  ;;  %v549_v47 = vpop.f32.mrb[1].mxu1 }
 0x1f5   : > { %v614_v48 = vadd.f32 %v729_v44, %v549_v47  ;;  %v811_v49 = vpop.f32.mrb[2].mxu1 }
 0x1f6   : > { %624 = vst [vmem:[%s222_s12 + $0x10] sm:$0xff] %v616_v46  ;;  %v617_v50 = vadd.f32 %v811_v49, %v729_v44  ;;  %v552_v51 = vpop.f32.mrb[3].mxu1 }
 0x1f7   : > { %622 = vst [vmem:[%s222_s12] sm:$0xff] %v614_v48  ;;  %v615_v52 = vadd.f32 %v729_v44, %v552_v51 }
 0x1f8   : > { %625 = vst [vmem:[%s222_s12 + $0x18] sm:$0xff] %v617_v50 }
 0x1f9   : > { %623 = vst [vmem:[%s222_s12 + $0x8] sm:$0xff] %v615_v52 }
 0x1fb   : > { %v814_v53 = vpop.f32.mrb[4].mxu1 }
 0x1fc   : > { %v620_v54 = vadd.f32 %v814_v53, %v729_v44  ;;  %v565_v55 = vpop.f32.mrb[5].mxu1 }
 0x1fd   : > { %v618_v56 = vadd.f32 %v729_v44, %v565_v55  ;;  %v815_v57 = vpop.f32.mrb[6].mxu1 }
 0x1fe   : > { %628 = vst [vmem:[%s222_s12 + $0x30] sm:$0xff] %v620_v54  ;;  %v621_v58 = vadd.f32 %v815_v57, %v729_v44  ;;  %v568_v59 = vpop.f32.mrb[7].mxu1 }
 0x1ff   : > { %626 = vst [vmem:[%s222_s12 + $0x20] sm:$0xff] %v618_v56  ;;  %v619_v60 = vadd.f32 %v729_v44, %v568_v59 }
 0x200   : > { %629 = vst [vmem:[%s222_s12 + $0x38] sm:$0xff] %v621_v58 }
 0x201   : > { %627 = vst [vmem:[%s222_s12 + $0x28] sm:$0xff] %v619_v60 }
 0x202 PF: > { %s14_s17 = sadd.s32 1, %s882_s17   ;;  %s1011_s15 = smov %s878_s16 }
 0x203   : > { %p11_p5 = scmp.ge.s32.totalorder %s14_s17, 4   ;;  %s1012_s16 = smov %s1014_s18 }
 0x205   :  { %13 = sbr.rel (!%p11_p5) target bundleno = 2 (0x2), region = 75 }

</bundles_post_ra>
